<compile_context>
chip_gen: v7x
topology: tpu7x:2x2x1
jax: 0.10.0
libtpu: 0.0.40
codegen_flags: <defaults>
</compile_context>

<pallas_src>
import functools

import jax
import jax.numpy as jnp
from jax.experimental import pallas as pl
from jax.experimental.pallas import tpu as pltpu

IN_FEATURES = 593     # cybsec UNSW-NB15 input width (from the pretrained MLP)
HIDDEN = 64
NUM_CLASSES = 1
BN_EPS = 1e-5

ROW_ALIGN = 32        # int8 sublane packing: 32 rows per (8,128) vreg tile


def _round_up(n, m):
    return ((n + m - 1) // m) * m


# -----------------------------------------------------------------------------
# Parameter construction (deterministic stand-in for the pretrained weights)
# -----------------------------------------------------------------------------
def _quantize_weight_int2(w):
    """Deterministic stand-in for Brevitas 2-bit weight quant.

    Symmetric narrow-range levels {-1, 0, +1} with max-abs per-tensor scale, so
    positive and negative weights saturate identically.
    """
    # TODO(synk): Brevitas CommonWeightQuant uses a learned per-tensor scale; this
    # max-abs narrow-range int2 stand-in will not be bit-exact with the FINN export.
    scale = jnp.maximum(jnp.max(jnp.abs(w)), 1e-8)
    q = jnp.clip(jnp.round(w / scale), -1.0, 1.0)
    return (q * scale).astype(jnp.float32)


def make_raw_params(key):
    """Raw (unfolded) parameters with the pretrained MLP's shapes."""
    ks = jax.random.split(key, 16)
    dims = [(IN_FEATURES, HIDDEN), (HIDDEN, HIDDEN), (HIDDEN, HIDDEN),
            (HIDDEN, NUM_CLASSES)]
    blocks = []
    ki = 0
    for li, (fan_in, fan_out) in enumerate(dims):
        bound = 1.0 / jnp.sqrt(jnp.float32(fan_in))
        w = jax.random.uniform(ks[ki], (fan_in, fan_out), jnp.float32, -bound, bound)
        ki += 1
        b = jax.random.uniform(ks[ki], (fan_out,), jnp.float32, -bound, bound)
        ki += 1
        w = _quantize_weight_int2(w)
        if li < 3:  # hidden blocks have BatchNorm1d (eval mode)
            gamma = 1.0 + 0.1 * jax.random.normal(ks[ki], (fan_out,), jnp.float32); ki += 1
            beta = 0.1 * jax.random.normal(ks[ki], (fan_out,), jnp.float32);        ki += 1
            mean = 0.05 * jnp.arange(fan_out, dtype=jnp.float32) / fan_out
            var = 1.0 + 0.01 * jnp.arange(fan_out, dtype=jnp.float32) / fan_out
            blocks.append((w, b, gamma, beta, mean, var))
        else:
            blocks.append((w, b))
    return tuple(blocks)


def fold_params(raw):
    """Fold eval-mode BatchNorm and the bipolar preprocess into the linears (f32)."""
    blk1, blk2, blk3, (w4, b4) = raw

    def fold_bn(blk):
        w, b, gamma, beta, mean, var = blk
        s = gamma / jnp.sqrt(var + BN_EPS)
        t = beta - mean * s
        return w * s[None, :], b * s + t

    w1, b1 = fold_bn(blk1)
    w2, b2 = fold_bn(blk2)
    w3, b3 = fold_bn(blk3)

    # Fold x' = (x + 1) / 2 into layer 1:  x'@W + b == x@(0.5 W) + (b + 0.5*colsum(W))
    b1 = b1 + 0.5 * jnp.sum(w1, axis=0)
    w1 = 0.5 * w1
    return (w1, b1, w2, b2, w3, b3, w4, b4)


def prepare_kernel_params(folded):
    """Weights -> bf16 (natural, unpadded shapes); biases -> f32 rows.

    The final (hidden -> 1) weight is stored as a (1, HIDDEN) f32 row so the kernel
    can do the projection on the VPU/XLU instead of a 1-lane-wide MXU matmul.
    """
    w1, b1, w2, b2, w3, b3, w4, b4 = folded
    return (
        w1.astype(jnp.bfloat16),                        # (593, 64)
        b1.reshape(1, -1).astype(jnp.float32),          # (1, 64)
        w2.astype(jnp.bfloat16),                        # (64, 64)
        b2.reshape(1, -1).astype(jnp.float32),          # (1, 64)
        w3.astype(jnp.bfloat16),                        # (64, 64)
        b3.reshape(1, -1).astype(jnp.float32),          # (1, 64)
        w4.reshape(1, -1).astype(jnp.float32),          # (1, 64)  row for VPU proj
        b4.reshape(1, NUM_CLASSES).astype(jnp.float32), # (1, 1)
    )


# -----------------------------------------------------------------------------
# Pallas kernel
# -----------------------------------------------------------------------------
def mlp_kernel(x_ref,
               w1_ref, b1_ref, w2_ref, b2_ref, w3_ref, b3_ref, w4_ref, b4_ref,
               out_ref):
    # x arrives as int8 {-1,+1}; upcast to bf16 in-VMEM (exact for +/-1).
    x = x_ref[...].astype(jnp.bfloat16)

    # Block 1 (bipolar preprocess + BatchNorm already folded into w1/b1)
    # TODO(synk): Brevitas QuantReLU(bit_width=2) uses a learned-scale uint2
    # activation quantizer; plain ReLU is used here.
    h = jnp.dot(x, w1_ref[...], preferred_element_type=jnp.float32)
    h = jnp.maximum(h + b1_ref[...], 0.0).astype(jnp.bfloat16)

    # Block 2
    h = jnp.dot(h, w2_ref[...], preferred_element_type=jnp.float32)
    h = jnp.maximum(h + b2_ref[...], 0.0).astype(jnp.bfloat16)

    # Block 3
    h = jnp.dot(h, w3_ref[...], preferred_element_type=jnp.float32)
    h = jnp.maximum(h + b3_ref[...], 0.0)                       # stay f32 for VPU proj

    # Final QuantLinear (hidden -> 1) on VPU/XLU + QuantIdentity(BINARY) sign quant.
    logits = jnp.sum(h * w4_ref[...], axis=-1, keepdims=True) + b4_ref[...]
    out_ref[...] = jnp.where(logits >= 0.0, 1.0, -1.0).astype(out_ref.dtype)


@functools.partial(jax.jit, static_argnames=("block_batch",))
def cybsec_mlp_forward(x_int8, kernel_params, *, block_batch=4096):
    """x_int8: [B, IN_FEATURES] int8 bipolar {-1,+1}. Returns [B, 1] f32 in {-1,+1}."""
    B = x_int8.shape[0]
    assert x_int8.shape[1] == IN_FEATURES
    assert x_int8.dtype == jnp.int8

    # Pad the batch only up to the int8 row-packing granule (<= 31 extra rows),
    # never up to a multiple of the tile.
    B_pad = _round_up(B, ROW_ALIGN)
    if B_pad != B:
        x_int8 = jnp.pad(x_int8, ((0, B_pad - B), (0, 0)))

    # Tile choice: multiple of 32 rows, capped by block_batch, and guaranteeing at
    # least 2 tiles when the batch allows it so v7x's second TensorCore gets work.
    block_batch = max(ROW_ALIGN, (block_batch // ROW_ALIGN) * ROW_ALIGN)
    TB = min(block_batch, max(ROW_ALIGN, _round_up(pl.cdiv(B_pad, 2), ROW_ALIGN)))
    grid = (pl.cdiv(B_pad, TB),)   # ragged last tile handled by Pallas

    weight_specs = [pl.BlockSpec(p.shape, lambda i: (0, 0)) for p in kernel_params]

    out = pl.pallas_call(
        mlp_kernel,
        out_shape=jax.ShapeDtypeStruct((B_pad, NUM_CLASSES), jnp.float32),
        grid=grid,
        in_specs=[pl.BlockSpec((TB, IN_FEATURES), lambda i: (i, 0))] + weight_specs,
        out_specs=pl.BlockSpec((TB, NUM_CLASSES), lambda i: (i, 0)),
        compiler_params=pltpu.CompilerParams(
            dimension_semantics=("parallel",),   # shards batch tiles across TCs on v7x
            vmem_limit_bytes=32 * 1024 * 1024,   # plenty for TB<=4096 on every gen
        ),
    )(x_int8, *kernel_params)
    return out[:B]


# -----------------------------------------------------------------------------
# Plain-JAX references for correctness checks
# -----------------------------------------------------------------------------
def reference_forward_raw(x_f32, raw):
    """Original (unfolded) CybSecMLPForExport semantics in f32."""
    blk1, blk2, blk3, (w4, b4) = raw
    h = (x_f32 + 1.0) / 2.0
    for (w, b, gamma, beta, mean, var) in (blk1, blk2, blk3):
        h = h @ w + b
        h = (h - mean) / jnp.sqrt(var + BN_EPS) * gamma + beta
        h = jnp.maximum(h, 0.0)        # Dropout(eval) == identity
    logits = h @ w4 + b4
    # TODO(synk): Brevitas BINARY quant tie-break at exactly 0 assumed to map to +1.
    return jnp.where(logits >= 0.0, 1.0, -1.0), logits


def reference_logits_folded_f32(x_f32, folded):
    """Folded math in f32 (validates the folding algebra against the raw model)."""
    w1, b1, w2, b2, w3, b3, w4, b4 = folded
    h = jnp.maximum(x_f32 @ w1 + b1, 0.0)
    h = jnp.maximum(h @ w2 + b2, 0.0)
    h = jnp.maximum(h @ w3 + b3, 0.0)
    return h @ w4 + b4


def reference_forward_folded_bf16(x_int8, kparams):
    """Plain-JAX mirror of the kernel math (int8 input, bf16 weights, f32 accum)."""
    w1, b1, w2, b2, w3, b3, w4row, b4 = kparams
    x = x_int8.astype(jnp.bfloat16)
    h = jnp.maximum(jnp.dot(x, w1, preferred_element_type=jnp.float32) + b1, 0.0)
    h = jnp.maximum(jnp.dot(h.astype(jnp.bfloat16), w2,
                            preferred_element_type=jnp.float32) + b2, 0.0)
    h = jnp.maximum(jnp.dot(h.astype(jnp.bfloat16), w3,
                            preferred_element_type=jnp.float32) + b3, 0.0)
    logits = jnp.sum(h * w4row, axis=-1, keepdims=True) + b4
    return jnp.where(logits >= 0.0, 1.0, -1.0), logits


if __name__ == "__main__":
    key = jax.random.PRNGKey(0)
    k_x, k_p, k_x2 = jax.random.split(key, 3)

    raw_params = make_raw_params(k_p)
    folded = fold_params(raw_params)
    kernel_params = prepare_kernel_params(folded)

    def run_and_check(kx, batch, block_batch=4096):
        # cybsec inputs are bipolar {-1, +1} feature vectors; ship them as int8.
        x_i8 = jnp.where(jax.random.bernoulli(kx, 0.5, (batch, IN_FEATURES)),
                         1, -1).astype(jnp.int8)
        out = jax.block_until_ready(
            cybsec_mlp_forward(x_i8, kernel_params, block_batch=block_batch))
        assert out.shape == (batch, NUM_CLASSES), out.shape
        assert bool(jnp.all(jnp.abs(out) == 1.0)), "output must be bipolar"
        ref_out, ref_logits = reference_forward_folded_bf16(x_i8, kernel_params)
        # Allow disagreement only where the logit is (numerically) at the sign boundary.
        ok = (out == ref_out) | (jnp.abs(ref_logits) < 1e-3)
        assert bool(jnp.all(ok)), "Pallas kernel disagrees with JAX reference"
        return x_i8

    # 1) small primary check (batch=2): single (padded) tile
    x_small = run_and_check(k_x, 2)
    # 2) multi-tile + ragged-last-tile check (batch=96 -> two 64-row tiles)
    run_and_check(k_x2, 96, block_batch=64)

    # 3) folding algebra preserves the original module's math (f32 vs f32)
    x_f32 = x_small.astype(jnp.float32)
    _, logits_raw = reference_forward_raw(x_f32, raw_params)
    logits_folded = reference_logits_folded_f32(x_f32, folded)
    assert bool(jnp.allclose(logits_raw, logits_folded, rtol=1e-4, atol=1e-4)), \
        "preprocess/BN folding changed the math"

    print("KERNEL_OK")
</pallas_src>

<mosaic_0001>
module attributes {stable_mosaic.version = 11 : i64} {
  func.func @mlp_kernel(%arg0: i32, %arg1: memref<32x593xi8, #tpu.memory_space<vmem>>, %arg2: memref<593x64xbf16, #tpu.memory_space<vmem>>, %arg3: memref<1x64xf32, #tpu.memory_space<vmem>>, %arg4: memref<64x64xbf16, #tpu.memory_space<vmem>>, %arg5: memref<1x64xf32, #tpu.memory_space<vmem>>, %arg6: memref<64x64xbf16, #tpu.memory_space<vmem>>, %arg7: memref<1x64xf32, #tpu.memory_space<vmem>>, %arg8: memref<1x64xf32, #tpu.memory_space<vmem>>, %arg9: memref<1x1xf32, #tpu.memory_space<vmem>>, %arg10: memref<32x1xf32, #tpu.memory_space<vmem>>) attributes {dimension_semantics = [#tpu.dimension_semantics<parallel>], iteration_bounds = array<i64: 1>, scalar_prefetch = 0 : i64, scratch_operands = 0 : i64, tpu.core_type = #tpu.core_type<tc>, window_params = [{transform_indices = @transform_0, window_bounds = array<i64: 32, 593>}, {pipeline_mode = #tpu.pipeline_mode<synchronous>, transform_indices = @transform_1, window_bounds = array<i64: 593, 64>}, {pipeline_mode = #tpu.pipeline_mode<synchronous>, transform_indices = @transform_2, window_bounds = array<i64: 1, 64>}, {pipeline_mode = #tpu.pipeline_mode<synchronous>, transform_indices = @transform_3, window_bounds = array<i64: 64, 64>}, {pipeline_mode = #tpu.pipeline_mode<synchronous>, transform_indices = @transform_4, window_bounds = array<i64: 1, 64>}, {pipeline_mode = #tpu.pipeline_mode<synchronous>, transform_indices = @transform_5, window_bounds = array<i64: 64, 64>}, {pipeline_mode = #tpu.pipeline_mode<synchronous>, transform_indices = @transform_6, window_bounds = array<i64: 1, 64>}, {pipeline_mode = #tpu.pipeline_mode<synchronous>, transform_indices = @transform_7, window_bounds = array<i64: 1, 64>}, {pipeline_mode = #tpu.pipeline_mode<synchronous>, transform_indices = @transform_8, window_bounds = array<i64: 1, 1>}, {transform_indices = @transform_9, window_bounds = array<i64: 32, 1>}]} {
    %c0 = arith.constant 0 : index
    %c0_0 = arith.constant 0 : index
    %0 = vector.load %arg1[%c0, %c0_0] : memref<32x593xi8, #tpu.memory_space<vmem>>, vector<32x593xi8>
    %1 = arith.sitofp %0 : vector<32x593xi8> to vector<32x593xbf16>
    %c0_1 = arith.constant 0 : index
    %c0_2 = arith.constant 0 : index
    %2 = vector.load %arg2[%c0_1, %c0_2] : memref<593x64xbf16, #tpu.memory_space<vmem>>, vector<593x64xbf16>
    %cst = arith.constant dense<0.000000e+00> : vector<32x64xf32>
    %3 = tpu.matmul %1, %2, %cst {dimension_numbers = #tpu.dot_dimension_numbers<[1], [0], [0], [1], [0, 0, 1, 1], [], []>} : vector<32x593xbf16>, vector<593x64xbf16>, vector<32x64xf32> -> vector<32x64xf32>
    %c0_3 = arith.constant 0 : index
    %c0_4 = arith.constant 0 : index
    %4 = vector.load %arg3[%c0_3, %c0_4] : memref<1x64xf32, #tpu.memory_space<vmem>>, vector<1x64xf32>
    %5 = vector.broadcast %4 : vector<1x64xf32> to vector<32x64xf32>
    %6 = arith.addf %3, %5 : vector<32x64xf32>
    %cst_5 = arith.constant 0.000000e+00 : f32
    %7 = vector.broadcast %cst_5 : f32 to vector<32x64xf32>
    %8 = arith.maximumf %6, %7 : vector<32x64xf32>
    %9 = arith.truncf %8 : vector<32x64xf32> to vector<32x64xbf16>
    %c0_6 = arith.constant 0 : index
    %c0_7 = arith.constant 0 : index
    %10 = vector.load %arg4[%c0_6, %c0_7] : memref<64x64xbf16, #tpu.memory_space<vmem>>, vector<64x64xbf16>
    %cst_8 = arith.constant dense<0.000000e+00> : vector<32x64xf32>
    %11 = tpu.matmul %9, %10, %cst_8 {dimension_numbers = #tpu.dot_dimension_numbers<[1], [0], [0], [1], [0, 0, 1, 1], [], []>} : vector<32x64xbf16>, vector<64x64xbf16>, vector<32x64xf32> -> vector<32x64xf32>
    %c0_9 = arith.constant 0 : index
    %c0_10 = arith.constant 0 : index
    %12 = vector.load %arg5[%c0_9, %c0_10] : memref<1x64xf32, #tpu.memory_space<vmem>>, vector<1x64xf32>
    %13 = vector.broadcast %12 : vector<1x64xf32> to vector<32x64xf32>
    %14 = arith.addf %11, %13 : vector<32x64xf32>
    %cst_11 = arith.constant 0.000000e+00 : f32
    %15 = vector.broadcast %cst_11 : f32 to vector<32x64xf32>
    %16 = arith.maximumf %14, %15 : vector<32x64xf32>
    %17 = arith.truncf %16 : vector<32x64xf32> to vector<32x64xbf16>
    %c0_12 = arith.constant 0 : index
    %c0_13 = arith.constant 0 : index
    %18 = vector.load %arg6[%c0_12, %c0_13] : memref<64x64xbf16, #tpu.memory_space<vmem>>, vector<64x64xbf16>
    %cst_14 = arith.constant dense<0.000000e+00> : vector<32x64xf32>
    %19 = tpu.matmul %17, %18, %cst_14 {dimension_numbers = #tpu.dot_dimension_numbers<[1], [0], [0], [1], [0, 0, 1, 1], [], []>} : vector<32x64xbf16>, vector<64x64xbf16>, vector<32x64xf32> -> vector<32x64xf32>
    %c0_15 = arith.constant 0 : index
    %c0_16 = arith.constant 0 : index
    %20 = vector.load %arg7[%c0_15, %c0_16] : memref<1x64xf32, #tpu.memory_space<vmem>>, vector<1x64xf32>
    %21 = vector.broadcast %20 : vector<1x64xf32> to vector<32x64xf32>
    %22 = arith.addf %19, %21 : vector<32x64xf32>
    %cst_17 = arith.constant 0.000000e+00 : f32
    %23 = vector.broadcast %cst_17 : f32 to vector<32x64xf32>
    %24 = arith.maximumf %22, %23 : vector<32x64xf32>
    %c0_18 = arith.constant 0 : index
    %c0_19 = arith.constant 0 : index
    %25 = vector.load %arg8[%c0_18, %c0_19] : memref<1x64xf32, #tpu.memory_space<vmem>>, vector<1x64xf32>
    %26 = vector.broadcast %25 : vector<1x64xf32> to vector<32x64xf32>
    %27 = arith.mulf %24, %26 : vector<32x64xf32>
    %cst_20 = arith.constant dense<0.000000e+00> : vector<32xf32>
    %28 = vector.multi_reduction <add>, %27, %cst_20 [1] : vector<32x64xf32> to vector<32xf32>
    %29 = vector.shape_cast %28 : vector<32xf32> to vector<32x1xf32>
    %c0_21 = arith.constant 0 : index
    %c0_22 = arith.constant 0 : index
    %30 = vector.load %arg9[%c0_21, %c0_22] : memref<1x1xf32, #tpu.memory_space<vmem>>, vector<1x1xf32>
    %31 = vector.broadcast %30 : vector<1x1xf32> to vector<32x1xf32>
    %32 = arith.addf %29, %31 : vector<32x1xf32>
    %cst_23 = arith.constant 0.000000e+00 : f32
    %33 = vector.broadcast %cst_23 : f32 to vector<32x1xf32>
    %34 = arith.cmpf oge, %32, %33 : vector<32x1xf32>
    %cst_24 = arith.constant 1.000000e+00 : f32
    %cst_25 = arith.constant -1.000000e+00 : f32
    %35 = vector.broadcast %cst_24 : f32 to vector<32x1xf32>
    %36 = vector.broadcast %cst_25 : f32 to vector<32x1xf32>
    %37 = arith.select %34, %35, %36 : vector<32x1xi1>, vector<32x1xf32>
    %c0_26 = arith.constant 0 : index
    %c0_27 = arith.constant 0 : index
    %38 = vector.load %arg10[%c0_26, %c0_27] : memref<32x1xf32, #tpu.memory_space<vmem>>, vector<32x1xf32>
    tpu.vector_store %arg10[%c0_26, %c0_27], %37 {strides = array<i32>} : memref<32x1xf32, #tpu.memory_space<vmem>>, vector<32x1xf32>,
    return
  }
  func.func @transform_0(%arg0: i32) -> (i32, i32) {
    %c0_i32 = arith.constant 0 : i32
    %c0_i32_0 = arith.constant 0 : i32
    return %arg0, %c0_i32 : i32, i32
  }
  func.func @transform_1(%arg0: i32) -> (i32, i32) {
    %c0_i32 = arith.constant 0 : i32
    %c0_i32_0 = arith.constant 0 : i32
    %c0_i32_1 = arith.constant 0 : i32
    return %c0_i32, %c0_i32_0 : i32, i32
  }
  func.func @transform_2(%arg0: i32) -> (i32, i32) {
    %c0_i32 = arith.constant 0 : i32
    %c0_i32_0 = arith.constant 0 : i32
    %c0_i32_1 = arith.constant 0 : i32
    return %c0_i32, %c0_i32_0 : i32, i32
  }
  func.func @transform_3(%arg0: i32) -> (i32, i32) {
    %c0_i32 = arith.constant 0 : i32
    %c0_i32_0 = arith.constant 0 : i32
    %c0_i32_1 = arith.constant 0 : i32
    return %c0_i32, %c0_i32_0 : i32, i32
  }
  func.func @transform_4(%arg0: i32) -> (i32, i32) {
    %c0_i32 = arith.constant 0 : i32
    %c0_i32_0 = arith.constant 0 : i32
    %c0_i32_1 = arith.constant 0 : i32
    return %c0_i32, %c0_i32_0 : i32, i32
  }
  func.func @transform_5(%arg0: i32) -> (i32, i32) {
    %c0_i32 = arith.constant 0 : i32
    %c0_i32_0 = arith.constant 0 : i32
    %c0_i32_1 = arith.constant 0 : i32
    return %c0_i32, %c0_i32_0 : i32, i32
  }
  func.func @transform_6(%arg0: i32) -> (i32, i32) {
    %c0_i32 = arith.constant 0 : i32
    %c0_i32_0 = arith.constant 0 : i32
    %c0_i32_1 = arith.constant 0 : i32
    return %c0_i32, %c0_i32_0 : i32, i32
  }
  func.func @transform_7(%arg0: i32) -> (i32, i32) {
    %c0_i32 = arith.constant 0 : i32
    %c0_i32_0 = arith.constant 0 : i32
    %c0_i32_1 = arith.constant 0 : i32
    return %c0_i32, %c0_i32_0 : i32, i32
  }
  func.func @transform_8(%arg0: i32) -> (i32, i32) {
    %c0_i32 = arith.constant 0 : i32
    %c0_i32_0 = arith.constant 0 : i32
    %c0_i32_1 = arith.constant 0 : i32
    return %c0_i32, %c0_i32_0 : i32, i32
  }
  func.func @transform_9(%arg0: i32) -> (i32, i32) {
    %c0_i32 = arith.constant 0 : i32
    %c0_i32_0 = arith.constant 0 : i32
    return %arg0, %c0_i32 : i32, i32
  }
}

</mosaic_0001>

<bundles_post_ra>
// kernel: cybsec_mlp_forward.1
= control target key start
LH: loop header
LB: loop body
LE: loop exit
PB: predicated region body
PF: predicated region fallthrough
CT: control target
= control target key end

     0   :  { %vm357_vm0 = vcmask 662528   ;;  %vm364_vm1 = vcmask 1040384   ;;  %v994_v52 = vmov 0   ;;  %vm562_vm2 = vcmask 523264   ;;  %s1240_s1 = inlined_call_operand.vmem [shape: bf16[593,64], index: 1, kind: input, shape index: {}]   ;;  %s1241_s0 = inlined_call_operand.vmem [shape: s8[32,593], index: 0, kind: input, shape index: {}]   ;;  %s1242_s3 = inlined_call_operand.vmem [shape: bf16[64,64], index: 3, kind: input, shape index: {}]   ;;  %s1243_s5 = inlined_call_operand.vmem [shape: bf16[64,64], index: 5, kind: input, shape index: {}]   ;;  %s1244_s2 = inlined_call_operand.vmem [shape: f32[1,64], index: 2, kind: input, shape index: {}]   ;;  %s1245_s4 = inlined_call_operand.vmem [shape: f32[1,64], index: 4, kind: input, shape index: {}]   ;;  %s1246_s8 = inlined_call_operand.<no memory space> [shape: f32[1,1], index: 8, kind: input, shape index: {}]   ;;  %s1247_s6 = inlined_call_operand.vmem [shape: f32[1,64], index: 6, kind: input, shape index: {}]   ;;  %s1248_s7 = inlined_call_operand.vmem [shape: f32[1,64], index: 7, kind: input, shape index: {}]   ;;  %s1249_s9 = inlined_call_operand.vmem [shape: f32[32,1], index: 9, kind: output, shape index: {}]  }
   0x1   :  { %v948_v0 = vld [vmem:[%s1240_s1 + $0x40] sm:$0xff]   ;;  %v952_v4 = vld [vmem:[%s1240_s1 + $0x48] sm:$0xff]   ;;  %v956_v8 = vld [vmem:[%s1240_s1 + $0x50] sm:$0xff]   ;;  %v366_v53 = vsel %vm364_vm1, 65535, %v994_v52  ;;  %vm764_vm3 = vcmask 7168  }
   0x2   :  { %v949_v1 = vld [vmem:[%s1240_s1] sm:$0xff]   ;;  %830 = vmatprep.subr.bf16.mxu0 %v948_v0  ;;  %v953_v5 = vld [vmem:[%s1240_s1 + $0x8] sm:$0xff]   ;;  %v957_v9 = vld [vmem:[%s1240_s1 + $0x10] sm:$0xff]  }
   0x3   :  { %v950_v2 = vld [vmem:[%s1240_s1 + $0xc0] sm:$0xff]   ;;  %831 = vmatpush3.bf16.msra.mxu0 %v949_v1  ;;  %v954_v6 = vld [vmem:[%s1240_s1 + $0xc8] sm:$0xff]   ;;  %v958_v10 = vld [vmem:[%s1240_s1 + $0xd0] sm:$0xff]  }
   0x4   :  { %v951_v3 = vld [vmem:[%s1240_s1 + $0x80] sm:$0xff]   ;;  %858 = vmatprep.subr.bf16.mxu1 %v950_v2  ;;  %832 = vmatprep.subr.bf16.mxu0 %v952_v4  ;;  %v955_v7 = vld [vmem:[%s1240_s1 + $0x88] sm:$0xff]   ;;  %v959_v11 = vld [vmem:[%s1240_s1 + $0x90] sm:$0xff]  }
   0x5   :  { %859 = vmatpush3.bf16.msra.mxu1 %v951_v3  ;;  %v960_v12 = vld [vmem:[%s1240_s1 + $0x58] sm:$0xff]   ;;  %v964_v16 = vld [vmem:[%s1240_s1 + $0x60] sm:$0xff]   ;;  %v968_v20 = vld [vmem:[%s1240_s1 + $0x68] sm:$0xff]  }
   0x6   :  { %860 = vmatprep.subr.bf16.mxu1 %v954_v6  ;;  %v961_v13 = vld [vmem:[%s1240_s1 + $0x18] sm:$0xff]   ;;  %v965_v17 = vld [vmem:[%s1240_s1 + $0x20] sm:$0xff]   ;;  %v969_v21 = vld [vmem:[%s1240_s1 + $0x28] sm:$0xff]  }
   0x7   :  { %833 = vmatpush3.bf16.msra.mxu0 %v953_v5  ;;  %v962_v14 = vld [vmem:[%s1240_s1 + $0xd8] sm:$0xff]   ;;  %v966_v18 = vld [vmem:[%s1240_s1 + $0xe0] sm:$0xff]   ;;  %v970_v22 = vld [vmem:[%s1240_s1 + $0xe8] sm:$0xff]  }
   0x8   :  { %834 = vmatprep.subr.bf16.mxu0 %v956_v8  ;;  %v963_v15 = vld [vmem:[%s1240_s1 + $0x98] sm:$0xff]   ;;  %v967_v19 = vld [vmem:[%s1240_s1 + $0xa0] sm:$0xff]   ;;  %v971_v23 = vld [vmem:[%s1240_s1 + $0xa8] sm:$0xff]  }
   0x9   :  { %861 = vmatpush3.bf16.msra.mxu1 %v955_v7  ;;  %v972_v24 = vld [vmem:[%s1240_s1 + $0x70] sm:$0xff]   ;;  %v976_v28 = vld [vmem:[%s1240_s1 + $0x78] sm:$0xff]   ;;  %v36_v31 = vld [vmem:[%s1241_s0 + $0x8] sm:$0xff] }
   0xa   :  { %862 = vmatprep.subr.bf16.mxu1 %v958_v10  ;;  %v973_v25 = vld [vmem:[%s1240_s1 + $0x30] sm:$0xff]   ;;  %v977_v29 = vld [vmem:[%s1240_s1 + $0x38] sm:$0xff]   ;;  %v41_v32 = vunpack.c.l.s8.bf16 %v36_v31  ;;  %v35_v34 = vld [vmem:[%s1241_s0] sm:$0xff]  ;;  %v46_v38 = vunpack.c.h.s8.bf16 %v36_v31 }
   0xb   :  { %835 = vmatpush3.bf16.msra.mxu0 %v957_v9  ;;  %v974_v26 = vld [vmem:[%s1240_s1 + $0xf0] sm:$0xff]   ;;  %v978_v30 = vld [vmem:[%s1240_s1 + $0xf8] sm:$0xff]   ;;  %v40_v35 = vunpack.c.l.s8.bf16 %v35_v34  ;;  %v980_v36 = vld [vmem:[%s1240_s1 + $0x100] sm:$0xff]   ;;  %v45_v45 = vunpack.c.h.s8.bf16 %v35_v34 }
   0xc   :  { %836 = vmatprep.subr.bf16.mxu0 %v960_v12  ;;  %v975_v27 = vld [vmem:[%s1240_s1 + $0xb0] sm:$0xff]   ;;  %v979_v33 = vld [vmem:[%s1240_s1 + $0xb8] sm:$0xff]   ;;  %402 = vmatprep.mubr.bf16.mxu0 %v41_v32  ;;  %v981_v43 = vld [vmem:[%s1240_s1 + $0x108] sm:$0xff]  }
   0xd   :  { %863 = vmatpush3.bf16.msra.mxu1 %v959_v11  ;;  %v38_v37 = vld [vmem:[%s1241_s0 + $0x18] sm:$0xff]  ;;  %v37_v41 = vld [vmem:[%s1241_s0 + $0x10] sm:$0xff]  ;;  %v39_v46 = vld [vmem:[%s1241_s0 + $0x20] sm:$0xff] }
   0xe   :  { %864 = vmatprep.subr.bf16.mxu1 %v962_v14  ;;  %v43_v39 = vunpack.c.l.s8.bf16 %v38_v37  ;;  %v48_v40 = vunpack.c.h.s8.bf16 %v38_v37  ;;  %v42_v42 = vunpack.c.l.s8.bf16 %v37_v41  ;;  %v982_v44 = vld [vmem:[%s1240_s1 + $0x110] sm:$0xff]   ;;  %v44_v47 = vunpack.c.l.s8.bf16 %v39_v46  ;;  %v983_v48 = vld [vmem:[%s1240_s1 + $0x118] sm:$0xff]   ;;  %v984_v50 = vld [vmem:[%s1240_s1 + $0x120] sm:$0xff]  }
   0xf   :  { %837 = vmatpush3.bf16.msra.mxu0 %v961_v13  ;;  %v47_v49 = vunpack.c.h.s8.bf16 %v37_v41  ;;  %v985_v51 = vld [vmem:[%s1240_s1 + $0x128] ss:$0 sps:$4 sm:$0x11]   ;;  %v49_v55 = vunpack.c.h.s8.bf16 %v39_v46  ;;  %v986_v56 = vld [vmem:[%s1242_s3] sm:$0xff]   ;;  %v988_v58 = vld [vmem:[%s1242_s3 + $0x10] sm:$0xff]  }
  0x10   :  { %838 = vmatprep.subr.bf16.mxu0 %v964_v16  ;;  %451 = vmatprep.mubr.bf16.mxu1 %v43_v39  ;;  %v368_v54 = vand.u32 %v985_v51, %v366_v53  ;;  %v987_v57 = vld [vmem:[%s1242_s3 + $0x8] sm:$0xff]   ;;  %v989_v59 = vld [vmem:[%s1242_s3 + $0x18] sm:$0xff]   ;;  %v990_v60 = vld [vmem:[%s1243_s5] sm:$0xff]  }
  0x11   :  { %865 = vmatpush3.bf16.msra.mxu1 %v963_v15  ;;  %v773_v62 = vld [vmem:[%s1244_s2] ss:$0 sm:$0xff]  ;;  %v993_v46 = vld [vmem:[%s1243_s5 + $0x18] sm:$0xff]  }
  0x12   :  { %866 = vmatprep.subr.bf16.mxu1 %v966_v18 }
  0x13   :  { %839 = vmatpush3.bf16.msra.mxu0 %v965_v17 }
  0x14   :  { %840 = vmatprep.subr.bf16.mxu0 %v968_v20 }
  0x15   :  { %867 = vmatpush3.bf16.msra.mxu1 %v967_v19 }
  0x16   :  { %868 = vmatprep.subr.bf16.mxu1 %v970_v22 }
  0x17   :  { %841 = vmatpush3.bf16.msra.mxu0 %v969_v21 }
  0x18   :  { %842 = vmatprep.subr.bf16.mxu0 %v972_v24 }
  0x19   :  { %869 = vmatpush3.bf16.msra.mxu1 %v971_v23 }
  0x1a   :  { %870 = vmatprep.subr.bf16.mxu1 %v974_v26 }
  0x1b   :  { %843 = vmatpush3.bf16.msra.mxu0 %v973_v25 }
  0x1c   :  { %844 = vmatprep.subr.bf16.mxu0 %v976_v28 }
  0x1d   :  { %871 = vmatpush3.bf16.msra.mxu1 %v975_v27 }
  0x1e   :  { %872 = vmatprep.subr.bf16.mxu1 %v978_v30 }
  0x1f   :  { %845 = vmatpush3.bf16.msra.mxu0 %v977_v29 }
  0x20   :  { %906 = vmatprep.subr.bf16.mxu0 %v980_v36 }
  0x21   :  { %873 = vmatpush3.bf16.msra.mxu1 %v979_v33 }
  0x22   :  { %403 = vmatmul.mubr.bf16.vlgmr.msra.gmra.mrb[0].mxu0 %v40_v35  ;;  %922 = vmatprep.subr.bf16.mxu1 %v986_v56 }
  0x23   :  { %907 = vmatpush3.bf16.msra.mxu0 %v980_v36  ;;  %410 = vmatprep.mubr.bf16.mxu0 %v46_v38 }
  0x24   :  { %452 = vmatmul.mubr.bf16.vlgmr.msra.gmra.mrb[0].mxu1 %v42_v42  ;;  %908 = vmatprep.subr.bf16.mxu0 %v981_v43 }
  0x25   :  { %459 = vmatprep.mubr.bf16.mxu1 %v48_v40  ;;  %923 = vmatpush3.bf16.msra.mxu1 %v986_v56 }
  0x26   :  { %924 = vmatprep.subr.bf16.mxu1 %v987_v57 }
  0x27   :  { %909 = vmatpush3.bf16.msra.mxu0 %v981_v43 }
  0x28   :  { %910 = vmatprep.subr.bf16.mxu0 %v982_v44 }
  0x29   :  { %925 = vmatpush3.bf16.msra.mxu1 %v987_v57 }
  0x2a   :  { %411 = vmatmul.mubr.bf16.gmra.mrb[4].mxu0 %v45_v45  ;;  %926 = vmatprep.subr.bf16.mxu1 %v988_v58  ;;  %v992_v45 = vld [vmem:[%s1243_s5 + $0x10] sm:$0xff]  }
  0x2b   :  { %911 = vmatpush3.bf16.msra.mxu0 %v982_v44  ;;  %918 = vmatprep.mubr.msk.bf16.mxu0 %vm357_vm0, %v44_v47  ;;  %v991_v44 = vld [vmem:[%s1243_s5 + $0x8] sm:$0xff]   ;;  %v814_v47 = vld [vmem:[%s1245_s4] ss:$0 sm:$0xff] }
  0x2c   :  { %912 = vmatprep.subr.bf16.mxu0 %v983_v48  ;;  %460 = vmatmul.mubr.bf16.gmra.mrb[4].mxu1 %v47_v49 }
  0x2d   :  { %927 = vmatpush3.bf16.msra.mxu1 %v988_v58 }
  0x2e   :  { %928 = vmatprep.subr.bf16.mxu1 %v989_v59 }
  0x2f   :  { %913 = vmatpush3.bf16.msra.mxu0 %v983_v48 }
  0x30   :  { %914 = vmatprep.subr.bf16.mxu0 %v984_v50 }
  0x31   :  { %929 = vmatpush3.bf16.msra.mxu1 %v989_v59 }
  0x32   :  { %934 = vmatprep.subr.bf16.mxu1 %v990_v60 }
  0x33   :  { %915 = vmatpush3.bf16.msra.mxu0 %v984_v50 }
  0x34   :  { %916 = vmatprep.subr.bf16.mxu0 %v368_v54 }
  0x37   :  { %917 = vmatpush3.bf16.msra.mxu0 %v368_v54 }
  0x3a   :  { %919 = vmatmul.mubr.msk.bf16.vlgmr.msra.gmra.mrb[8].mxu0 %vm357_vm0, %v49_v55 }
  0xf5   :  { %v846_v61 = vpop.f32.mrb[0].mxu0 }
  0xf6   :  { %v847_v63 = vpop.f32.mrb[1].mxu0 }
  0xf7   :  { %v848_v0 = vadd.f32 %v847_v63, %v846_v61  ;;  %v849_v1 = vpop.f32.mrb[2].mxu0  ;;  %v874_v2 = vpop.f32.mrb[0].mxu1  ;;  %v821_v63 = vld [vmem:[%s1247_s6] ss:$0 sm:$0xff] }
  0xf8   :  { %v850_v3 = vpop.f32.mrb[3].mxu0  ;;  %v875_v4 = vpop.f32.mrb[1].mxu1 }
  0xf9   :  { %v405_v5 = vadd.f32 %v848_v0, %v773_v62  ;;  %v851_v6 = vadd.f32 %v850_v3, %v849_v1  ;;  %v876_v7 = vadd.f32 %v875_v4, %v874_v2  ;;  %v877_v8 = vpop.f32.mrb[2].mxu1 }
  0xfa   :  { %v878_v9 = vpop.f32.mrb[3].mxu1 }
  0xfb   :  { %v408_v10 = vadd.f32 %v851_v6, %v773_v62  ;;  %v879_v11 = vadd.f32 %v878_v9, %v877_v8  ;;  %v454_v12 = vadd.f32 %v876_v7, %v405_v5  ;;  %v828_v5 = vld [vmem:[%s1248_s7] ss:$0 sm:$0xff] }
  0xfd   :  { %v852_v13 = vpop.f32.mrb[4].mxu0  ;;  %v457_v14 = vadd.f32 %v879_v11, %v408_v10 }
  0xfe   :  { %v853_v15 = vpop.f32.mrb[5].mxu0 }
  0xff   :  { %v854_v16 = vadd.f32 %v853_v15, %v852_v13  ;;  %v855_v17 = vpop.f32.mrb[6].mxu0  ;;  %v880_v18 = vpop.f32.mrb[4].mxu1 }
 0x100   :  { %v856_v19 = vpop.f32.mrb[7].mxu0  ;;  %v881_v20 = vpop.f32.mrb[5].mxu1 }
 0x101   :  { %v413_v21 = vadd.f32 %v854_v16, %v773_v62  ;;  %v857_v22 = vadd.f32 %v856_v19, %v855_v17  ;;  %v882_v23 = vadd.f32 %v881_v20, %v880_v18  ;;  %v883_v24 = vpop.f32.mrb[6].mxu1 }
 0x102   :  { %v884_v25 = vpop.f32.mrb[7].mxu1 }
 0x103   :  { %v416_v26 = vadd.f32 %v857_v22, %v773_v62  ;;  %v885_v27 = vadd.f32 %v884_v25, %v883_v24  ;;  %v462_v28 = vadd.f32 %v882_v23, %v413_v21  ;;  %v14_v62 = vstv %s1246_s8 }
 0x104   :  { %15 = vst [vmem:[#allocation2] sm:$0x1] %v14_v62 }
 0x105   :  { %v465_v29 = vadd.f32 %v885_v27, %v416_v26  ;;  %v995_v26 = vmov -1.0  }
 0x10b   :  { %v829_v21 = vld [vmem:[#allocation2] ss:$0 sm:$0xff] }
 0x10d   :  { %v920_v30 = vpop.f32.mrb[8].mxu0 }
 0x10e   :  { %v511_v31 = vadd.f32 %v920_v30, %v462_v28  ;;  %v502_v32 = vpop.f32.mrb[9].mxu0 }
 0x10f   :  { %v503_v33 = vadd.f32 %v502_v32, %v454_v12  ;;  %v921_v34 = vpop.f32.mrb[10].mxu0 }
 0x110   :  { %v514_v35 = vadd.f32 %v921_v34, %v465_v29  ;;  %v505_v36 = vpop.f32.mrb[11].mxu0  ;;  %v519_v38 = vmax.f32 %v511_v31, 0.0 }
 0x111   :  { %v506_v37 = vadd.f32 %v505_v36, %v457_v14  ;;  %v517_v40 = vmax.f32 %v503_v33, 0.0 }
 0x112   :  { %v520_v39 = vmax.f32 %v514_v35, 0.0 }
 0x113   :  { %v518_v41 = vmax.f32 %v506_v37, 0.0 }
 0x114   :  { %v522_v42 = vpack.c.bf16 %v520_v39, %v519_v38 }
 0x115   :  { %v521_v43 = vpack.c.bf16 %v518_v41, %v517_v40 }
 0x117   :  { %930 = vmatprep.mubr.msk.bf16.mxu1 %vm562_vm2, %v521_v43 }
 0x118   :  { %931 = vmatmul.mubr.msk.bf16.vlgmr.msra.gmra.mrb[8].mxu1 %vm562_vm2, %v522_v42 }
 0x119   :  { %935 = vmatpush3.bf16.msra.mxu1 %v990_v60 }
 0x11a   :  { %936 = vmatprep.subr.bf16.mxu1 %v991_v44 }
 0x11d   :  { %937 = vmatpush3.bf16.msra.mxu1 %v991_v44 }
 0x11e   :  { %938 = vmatprep.subr.bf16.mxu1 %v992_v45 }
 0x121   :  { %939 = vmatpush3.bf16.msra.mxu1 %v992_v45 }
 0x122   :  { %940 = vmatprep.subr.bf16.mxu1 %v993_v46 }
 0x125   :  { %941 = vmatpush3.bf16.msra.mxu1 %v993_v46 }
 0x1eb   :  { %v932_v48 = vpop.f32.mrb[8].mxu1 }
 0x1ec   :  { %v612_v49 = vadd.f32 %v932_v48, %v814_v47  ;;  %v603_v50 = vpop.f32.mrb[9].mxu1 }
 0x1ed   :  { %v604_v51 = vadd.f32 %v814_v47, %v603_v50  ;;  %v933_v52 = vpop.f32.mrb[10].mxu1 }
 0x1ee   :  { %v615_v53 = vadd.f32 %v933_v52, %v814_v47  ;;  %v606_v54 = vpop.f32.mrb[11].mxu1  ;;  %v620_v56 = vmax.f32 %v612_v49, 0.0 }
 0x1ef   :  { %v607_v55 = vadd.f32 %v814_v47, %v606_v54  ;;  %v618_v58 = vmax.f32 %v604_v51, 0.0 }
 0x1f0   :  { %v621_v57 = vmax.f32 %v615_v53, 0.0 }
 0x1f1   :  { %v619_v59 = vmax.f32 %v607_v55, 0.0 }
 0x1f2   :  { %v623_v60 = vpack.c.bf16 %v621_v57, %v620_v56 }
 0x1f3   :  { %v622_v61 = vpack.c.bf16 %v619_v59, %v618_v58 }
 0x1f5   :  { %942 = vmatprep.mubr.msk.bf16.mxu1 %vm562_vm2, %v622_v61 }
 0x1f6   :  { %943 = vmatmul.mubr.msk.bf16.vlgmr.msra.gmra.mrb[12].mxu1 %vm562_vm2, %v623_v60 }
 0x2c9   :  { %v944_v0 = vpop.f32.mrb[12].mxu1 }
 0x2ca   :  { %v712_v1 = vadd.f32 %v944_v0, %v821_v63  ;;  %v703_v2 = vpop.f32.mrb[13].mxu1 }
 0x2cb   :  { %v704_v3 = vadd.f32 %v821_v63, %v703_v2  ;;  %v945_v4 = vpop.f32.mrb[14].mxu1 }
 0x2cc   :  { %v720_v6 = vmax.f32 %v712_v1, 0.0  ;;  %v715_v7 = vadd.f32 %v945_v4, %v821_v63  ;;  %v706_v8 = vpop.f32.mrb[15].mxu1 }
 0x2cd   :  { %v718_v9 = vmax.f32 %v704_v3, 0.0  ;;  %v707_v10 = vadd.f32 %v821_v63, %v706_v8 }
 0x2ce   :  { %v721_v11 = vmax.f32 %v715_v7, 0.0  ;;  %v731_v12 = vmul.f32 %v828_v5, %v720_v6 }
 0x2cf   :  { %v719_v13 = vmax.f32 %v707_v10, 0.0  ;;  %v729_v14 = vmul.f32 %v828_v5, %v718_v9 }
 0x2d0   :  { %v739_v15 = vsel %vm562_vm2, %v731_v12, 0.0  ;;  %v732_v16 = vmul.f32 %v828_v5, %v721_v11 }
 0x2d1   :  { %740 = vadd.xlane.f32.xlu1 %v739_v15  ;;  %v733_v17 = vsel %vm562_vm2, %v729_v14, 0.0  ;;  %v730_v18 = vmul.f32 %v828_v5, %v719_v13 }
 0x2d2   :  { %734 = vadd.xlane.f32.xlu0 %v733_v17  ;;  %v742_v19 = vsel %vm562_vm2, %v732_v16, 0.0 }
 0x2d3   :  { %v736_v20 = vsel %vm562_vm2, %v730_v18, 0.0 }
 0x2d5   :  { %743 = vadd.xlane.f32.xlu1 %v742_v19 }
 0x2d6   :  { %737 = vadd.xlane.f32.xlu0 %v736_v20 }
 0x35e   :  { %v741_v22 = vpop.xlane.xlu1 %740 }
 0x35f   :  { %v754_v23 = vadd.f32 %v829_v21, %v741_v22  ;;  %v735_v24 = vpop.xlane.xlu0 %734 }
 0x360   :  { %v752_v25 = vadd.f32 %v829_v21, %v735_v24 }
 0x361   :  { %vm758_vm4 = vcmp.ge.f32.partialorder %v754_v23, 0.0 }
 0x362   :  { %v762_v27 = vsel %vm758_vm4, 1.0, %v995_v26  ;;  %vm756_vm5 = vcmp.ge.f32.partialorder %v752_v25, 0.0  ;;  %v744_v28 = vpop.xlane.xlu1 %743 }
 0x363   :  { %767 = vst.msk [vmem:[%s1249_s9 + $0x10] sm:$0xff] %vm764_vm3, %v762_v27  ;;  %v760_v29 = vsel %vm756_vm5, 1.0, %v995_v26  ;;  %v755_v30 = vadd.f32 %v829_v21, %v744_v28  ;;  %v738_v31 = vpop.xlane.xlu0 %737 }
 0x364   :  { %765 = vst.msk [vmem:[%s1249_s9] sm:$0xff] %vm764_vm3, %v760_v29  ;;  %v753_v32 = vadd.f32 %v829_v21, %v738_v31 }
 0x365   :  { %vm759_vm6 = vcmp.ge.f32.partialorder %v755_v30, 0.0 }
 0x366   :  { %v763_v33 = vsel %vm759_vm6, 1.0, %v995_v26  ;;  %vm757_vm7 = vcmp.ge.f32.partialorder %v753_v32, 0.0 }
 0x367   :  { %768 = vst.msk [vmem:[%s1249_s9 + $0x18] sm:$0xff] %vm764_vm3, %v763_v33  ;;  %v761_v34 = vsel %vm757_vm7, 1.0, %v995_v26 }
 0x368   :  { %766 = vst.msk [vmem:[%s1249_s9 + $0x8] sm:$0xff] %vm764_vm3, %v761_v34 }

</bundles_post_ra>
